<compile_context>
chip_gen: v6e
topology: v6e:2x2x1
jax: 0.10.0
libtpu: 0.0.40
codegen_flags: <defaults>
</compile_context>

<pallas_src>
import functools

import jax
import jax.numpy as jnp
from jax.experimental import pallas as pl
from jax.experimental.pallas import tpu as pltpu

BN_EPS = 1e-5
ACT_DTYPE = jnp.bfloat16


def _round_up(x, m):
    return (x + m - 1) // m * m


@functools.lru_cache(maxsize=None)
def _vmem_limit_bytes():
    """Per-TensorCore VMEM budget, safe on v5e/v6e (128 MiB) and v7x (64 MiB)."""
    cap = 64 * 1024 * 1024
    try:
        info = pltpu.get_tpu_info()
        cap = int(getattr(info, "vmem_capacity_bytes", cap) or cap)
    except Exception:
        pass
    budget = int(cap * 0.45)
    return int(min(max(budget, 24 * 1024 * 1024), 48 * 1024 * 1024))


def _compiler_params(semantics):
    return pltpu.CompilerParams(
        dimension_semantics=semantics,
        vmem_limit_bytes=_vmem_limit_bytes(),
    )


def _pick_tile_m(M):
    """Row tile for the conv1 GEMM: prefer big tiles that divide M and leave
    >=2 grid programs (v7x megacore); otherwise pad M up to a 256 multiple."""
    for tm in (512, 256, 128):
        if M % tm == 0 and M // tm >= 2:
            return tm
    for tm in (512, 256, 128):
        if M % tm == 0:
            return tm
    return 256


# ----------------------------- Pallas kernels -----------------------------

def _gemm_bn_kernel(a_ref, b_ref, scale_ref, bias_ref, o_ref, *, relu):
    # conv-as-GEMM (bf16 operands, f32 accumulate) + folded BN (+ ReLU).
    acc = jnp.dot(a_ref[...], b_ref[...], preferred_element_type=jnp.float32)
    y = acc * scale_ref[...] + bias_ref[...]
    if relu:
        y = jnp.maximum(y, 0.0)
    o_ref[...] = y.astype(o_ref.dtype)


def _tap_accumulate_s1(x_ref, w_ref, Ho, Wo):
    """9-tap direct 3x3/stride-1 conv: sum_{i,j} X[i:i+Ho, j:j+Wo] @ W[i,j]."""
    xv = x_ref[0]                                # (Hp, Wp, Cin) bf16
    cin = xv.shape[-1]
    tn = w_ref.shape[-1]
    acc = jnp.zeros((Ho * Wo, tn), jnp.float32)
    for i in range(3):
        for j in range(3):
            a = xv[i:i + Ho, j:j + Wo, :].reshape(Ho * Wo, cin)
            acc = acc + jnp.dot(a, w_ref[i * 3 + j],
                                preferred_element_type=jnp.float32)
    return acc


def _conv3x3_s1_kernel(x_ref, w_ref, scale_ref, bias_ref, o_ref, *, Ho, Wo, relu):
    y = _tap_accumulate_s1(x_ref, w_ref, Ho, Wo) * scale_ref[...] + bias_ref[...]
    if relu:
        y = jnp.maximum(y, 0.0)
    o_ref[0] = y.reshape(Ho, Wo, -1).astype(o_ref.dtype)


def _conv3x3_s1_res_kernel(x_ref, w_ref, scale_ref, bias_ref, res_ref, o_ref,
                           *, Ho, Wo):
    # conv3x3(s1) + BN + residual add + ReLU (BasicBlock tail, no downsample).
    y = _tap_accumulate_s1(x_ref, w_ref, Ho, Wo) * scale_ref[...] + bias_ref[...]
    y = y + res_ref[0].reshape(Ho * Wo, -1).astype(jnp.float32)
    o_ref[0] = jnp.maximum(y, 0.0).reshape(Ho, Wo, -1).astype(o_ref.dtype)


def _conv3x3_s1_down_kernel(x_ref, w_ref, scale_ref, bias_ref,
                            xds_ref, wd_ref, dsc_ref, dbi_ref, o_ref, *, Ho, Wo):
    # conv3x3(s1) + BN, fused 1x1-stride-2 downsample GEMM + its BN,
    # residual add + ReLU (transition BasicBlock tail).
    y = _tap_accumulate_s1(x_ref, w_ref, Ho, Wo) * scale_ref[...] + bias_ref[...]
    a = xds_ref[0].reshape(Ho * Wo, -1)
    ds = jnp.dot(a, wd_ref[...], preferred_element_type=jnp.float32)
    y = y + ds * dsc_ref[...] + dbi_ref[...]
    o_ref[0] = jnp.maximum(y, 0.0).reshape(Ho, Wo, -1).astype(o_ref.dtype)


def _conv3x3_s2_kernel(ee_ref, eo_ref, oe_ref, oo_ref, w_ref, scale_ref,
                       bias_ref, o_ref, *, Ho, Wo):
    # 3x3 / stride-2 conv from 4 even/odd planes; tap (i,j) -> plane
    # (i%2, j%2) at row/col offsets (i//2, j//2). Contiguous slices only.
    ee = ee_ref[0]
    eo = eo_ref[0]
    oe = oe_ref[0]
    oo = oo_ref[0]
    planes = ((ee, eo), (oe, oo))
    cin = ee.shape[-1]
    tn = w_ref.shape[-1]
    acc = jnp.zeros((Ho * Wo, tn), jnp.float32)
    for i in range(3):
        rp, di = i % 2, i // 2
        for j in range(3):
            cp, dj = j % 2, j // 2
            pv = planes[rp][cp]
            a = pv[di:di + Ho, dj:dj + Wo, :].reshape(Ho * Wo, cin)
            acc = acc + jnp.dot(a, w_ref[i * 3 + j],
                                preferred_element_type=jnp.float32)
    y = acc * scale_ref[...] + bias_ref[...]
    o_ref[0] = jnp.maximum(y, 0.0).reshape(Ho, Wo, -1).astype(o_ref.dtype)


def _maxpool_kernel(ee_ref, eo_ref, oe_ref, oo_ref, o_ref, *, Ho, Wo):
    # 3x3 / stride-2 / pad-1 max pooling from 4 even/odd planes.
    ee = ee_ref[0]
    eo = eo_ref[0]
    oe = oe_ref[0]
    oo = oo_ref[0]
    m = oo[:Ho, :Wo, :]                               # center tap (2h+1, 2w+1)
    for di in (0, 1):
        for dj in (0, 1):
            m = jnp.maximum(m, ee[di:di + Ho, dj:dj + Wo, :])
    for di in (0, 1):
        m = jnp.maximum(m, eo[di:di + Ho, :Wo, :])
    for dj in (0, 1):
        m = jnp.maximum(m, oe[:Ho, dj:dj + Wo, :])
    o_ref[0] = m


def _avgpool_kernel(x_ref, o_ref):
    # (N, HW, TC) -> mean over spatial (f32 math).
    o_ref[...] = jnp.mean(x_ref[...].astype(jnp.float32), axis=1)


# ----------------------------- Conv / pool wrappers -----------------------------

def conv1_7x7_bn_relu(x, p):
    """Stem: 7x7 / stride-2 / pad-3 conv (Cin=3) + BN + ReLU as an im2col GEMM.
    K is padded to a 128 multiple; Cout is padded to 128 lanes (carried)."""
    N, H, W, Cin = x.shape
    kh = kw = 7
    s, pad = 2, 3
    Ho = (H + 2 * pad - kh) // s + 1
    Wo = (W + 2 * pad - kw) // s + 1
    xp = jnp.pad(x, ((0, 0), (pad, pad), (pad, pad), (0, 0)))
    cols = [xp[:, i:i + s * Ho:s, j:j + s * Wo:s, :]
            for i in range(kh) for j in range(kw)]
    a = jnp.concatenate(cols, axis=-1)                 # (N, Ho, Wo, 147)
    K = kh * kw * Cin
    Kp = p["w"].shape[0]
    if Kp != K:
        a = jnp.pad(a, ((0, 0), (0, 0), (0, 0), (0, Kp - K)))
    M = N * Ho * Wo
    a = a.reshape(M, Kp)
    TM = _pick_tile_m(M)
    Mp = _round_up(M, TM)
    if Mp != M:
        a = jnp.pad(a, ((0, Mp - M), (0, 0)))
    cout_p = p["cout_p"]
    TN = min(128, cout_p)

    out = pl.pallas_call(
        functools.partial(_gemm_bn_kernel, relu=True),
        out_shape=jax.ShapeDtypeStruct((Mp, cout_p), ACT_DTYPE),
        grid=(Mp // TM, cout_p // TN),
        in_specs=[
            pl.BlockSpec((TM, Kp), lambda i, j: (i, 0)),
            pl.BlockSpec((Kp, TN), lambda i, j: (0, j)),
            pl.BlockSpec((1, TN), lambda i, j: (0, j)),
            pl.BlockSpec((1, TN), lambda i, j: (0, j)),
        ],
        out_specs=pl.BlockSpec((TM, TN), lambda i, j: (i, j)),
        compiler_params=_compiler_params(("parallel", "parallel")),
    )(a, p["w"], p["scale"], p["bias"])
    if Mp != M:
        out = out[:M]
    return out.reshape(N, Ho, Wo, cout_p)


def conv3x3_s1(x, p, *, relu=True, residual=None, down=None):
    """Direct 3x3 / stride-1 conv + folded BN [+ residual / fused downsample
    + ReLU].  No im2col: 9-tap GEMM accumulation inside one kernel."""
    N, H, W, C = x.shape
    Ho, Wo = H, W
    Hp, Wp = H + 2, W + 2
    xp = jnp.pad(x, ((0, 0), (1, 1), (1, 1), (0, 0)))
    cout_p = p["cout_p"]
    TN = min(256, cout_p)
    grid = (N, cout_p // TN)

    in_specs = [
        pl.BlockSpec((1, Hp, Wp, C), lambda n, c: (n, 0, 0, 0)),
        pl.BlockSpec((9, C, TN), lambda n, c: (0, 0, c)),
        pl.BlockSpec((1, TN), lambda n, c: (0, c)),
        pl.BlockSpec((1, TN), lambda n, c: (0, c)),
    ]
    args = [xp, p["w"], p["scale"], p["bias"]]

    if down is not None:
        x_ds, dp = down
        Cd = x_ds.shape[-1]
        in_specs += [
            pl.BlockSpec((1, Ho, Wo, Cd), lambda n, c: (n, 0, 0, 0)),
            pl.BlockSpec((Cd, TN), lambda n, c: (0, c)),
            pl.BlockSpec((1, TN), lambda n, c: (0, c)),
            pl.BlockSpec((1, TN), lambda n, c: (0, c)),
        ]
        args += [x_ds, dp["w"], dp["scale"], dp["bias"]]
        kernel = functools.partial(_conv3x3_s1_down_kernel, Ho=Ho, Wo=Wo)
    elif residual is not None:
        in_specs.append(pl.BlockSpec((1, Ho, Wo, TN), lambda n, c: (n, 0, 0, c)))
        args.append(residual)
        kernel = functools.partial(_conv3x3_s1_res_kernel, Ho=Ho, Wo=Wo)
    else:
        kernel = functools.partial(_conv3x3_s1_kernel, Ho=Ho, Wo=Wo, relu=relu)

    return pl.pallas_call(
        kernel,
        out_shape=jax.ShapeDtypeStruct((N, Ho, Wo, cout_p), ACT_DTYPE),
        grid=grid,
        in_specs=in_specs,
        out_specs=pl.BlockSpec((1, Ho, Wo, TN), lambda n, c: (n, 0, 0, c)),
        compiler_params=_compiler_params(("parallel", "parallel")),
    )(*args)


def _even_odd_planes(x, Ho, Wo, pad_value=0.0):
    """Pad spatially (1 left/top, enough right/bottom) and split into the four
    even/odd row/col planes, each (N, Ho+1, Wo+1, C).  One cheap XLA copy."""
    N, H, W, C = x.shape
    Hp2 = 2 * (Ho + 1)
    Wp2 = 2 * (Wo + 1)
    xp = jnp.pad(x, ((0, 0), (1, Hp2 - H - 1), (1, Wp2 - W - 1), (0, 0)),
                 constant_values=pad_value)
    xee = xp[:, 0::2, 0::2, :]
    xeo = xp[:, 0::2, 1::2, :]
    xoe = xp[:, 1::2, 0::2, :]
    xoo = xp[:, 1::2, 1::2, :]
    return xee, xeo, xoe, xoo


def conv3x3_s2(x, p):
    """Direct 3x3 / stride-2 / pad-1 conv + folded BN + ReLU from even/odd
    planes.  Also returns the stride-2 subsample of x (== xoo plane) that the
    fused 1x1 downsample of the same BasicBlock consumes later."""
    N, H, W, C = x.shape
    Ho = (H - 1) // 2 + 1
    Wo = (W - 1) // 2 + 1
    xee, xeo, xoe, xoo = _even_odd_planes(x, Ho, Wo)
    x_ds = xoo[:, :Ho, :Wo, :]                      # x[:, ::2, ::2, :]
    cout_p = p["cout_p"]
    TN = min(256, cout_p)
    plane_spec = pl.BlockSpec((1, Ho + 1, Wo + 1, C), lambda n, c: (n, 0, 0, 0))

    out = pl.pallas_call(
        functools.partial(_conv3x3_s2_kernel, Ho=Ho, Wo=Wo),
        out_shape=jax.ShapeDtypeStruct((N, Ho, Wo, cout_p), ACT_DTYPE),
        grid=(N, cout_p // TN),
        in_specs=[plane_spec, plane_spec, plane_spec, plane_spec,
                  pl.BlockSpec((9, C, TN), lambda n, c: (0, 0, c)),
                  pl.BlockSpec((1, TN), lambda n, c: (0, c)),
                  pl.BlockSpec((1, TN), lambda n, c: (0, c))],
        out_specs=pl.BlockSpec((1, Ho, Wo, TN), lambda n, c: (n, 0, 0, c)),
        compiler_params=_compiler_params(("parallel", "parallel")),
    )(xee, xeo, xoe, xoo, p["w"], p["scale"], p["bias"])
    return out, x_ds


def maxpool_3x3_s2_p1(x):
    """MaxPool2d(kernel=3, stride=2, padding=1) on NHWC.  The 9-tap reduction
    happens in-kernel from 4 even/odd planes (no 9x stacked tensor in HBM)."""
    N, H, W, C = x.shape
    Ho = (H - 1) // 2 + 1
    Wo = (W - 1) // 2 + 1
    xee, xeo, xoe, xoo = _even_odd_planes(x, Ho, Wo, pad_value=-jnp.inf)
    plane_spec = pl.BlockSpec((1, Ho + 1, Wo + 1, C), lambda n: (n, 0, 0, 0))

    return pl.pallas_call(
        functools.partial(_maxpool_kernel, Ho=Ho, Wo=Wo),
        out_shape=jax.ShapeDtypeStruct((N, Ho, Wo, C), x.dtype),
        grid=(N,),
        in_specs=[plane_spec, plane_spec, plane_spec, plane_spec],
        out_specs=pl.BlockSpec((1, Ho, Wo, C), lambda n: (n, 0, 0, 0)),
        compiler_params=_compiler_params(("parallel",)),
    )(xee, xeo, xoe, xoo)


def avgpool_global(x):
    """AdaptiveAvgPool2d(1) on NHWC -> (N, C) f32, tiled over 128-lane channels."""
    N, H, W, C = x.shape
    xr = x.reshape(N, H * W, C)
    TC = 128 if C % 128 == 0 else C
    return pl.pallas_call(
        _avgpool_kernel,
        out_shape=jax.ShapeDtypeStruct((N, C), jnp.float32),
        grid=(C // TC,),
        in_specs=[pl.BlockSpec((N, H * W, TC), lambda j: (0, 0, j))],
        out_specs=pl.BlockSpec((N, TC), lambda j: (0, j)),
        compiler_params=_compiler_params(("parallel",)),
    )(xr)


# ----------------------------- Parameters (pre-packed) -----------------------------

def _bn_fold(gamma, beta, mean, var):
    scale = gamma / jnp.sqrt(var + BN_EPS)
    return scale, beta - mean * scale


def _pad_vec(v, n):
    return jnp.pad(v, (0, n - v.shape[0]))


def _pack_affine(scale, bias, cout_p):
    return (_pad_vec(scale, cout_p).reshape(1, cout_p).astype(jnp.float32),
            _pad_vec(bias, cout_p).reshape(1, cout_p).astype(jnp.float32))


def _pack_conv3x3(w, scale, bias, cin_p, cout_p):
    """PyTorch (Cout,Cin,3,3) -> (9, Cin_p, Cout_p) bf16 + (1, Cout_p) f32 BN."""
    cout, cin = w.shape[0], w.shape[1]
    wt = jnp.transpose(w, (2, 3, 1, 0))                          # (3,3,cin,cout)
    wt = jnp.pad(wt, ((0, 0), (0, 0), (0, cin_p - cin), (0, cout_p - cout)))
    wt = wt.reshape(9, cin_p, cout_p).astype(ACT_DTYPE)
    s, b = _pack_affine(scale, bias, cout_p)
    return {"w": wt, "scale": s, "bias": b, "cout_p": cout_p}


def _pack_conv1x1(w, scale, bias, cin_p, cout_p):
    """PyTorch (Cout,Cin,1,1) -> (Cin_p, Cout_p) bf16 + folded BN."""
    cout, cin = w.shape[0], w.shape[1]
    wt = jnp.transpose(w[:, :, 0, 0], (1, 0))
    wt = jnp.pad(wt, ((0, cin_p - cin), (0, cout_p - cout))).astype(ACT_DTYPE)
    s, b = _pack_affine(scale, bias, cout_p)
    return {"w": wt, "scale": s, "bias": b, "cout_p": cout_p}


def _pack_conv7x7(w, scale, bias, cout_p, k_p):
    """PyTorch (Cout,Cin,7,7) -> im2col GEMM B (K_p, Cout_p) bf16 + folded BN."""
    cout, cin, kh, kw = w.shape
    wt = jnp.transpose(w, (2, 3, 1, 0)).reshape(kh * kw * cin, cout)
    wt = jnp.pad(wt, ((0, k_p - kh * kw * cin), (0, cout_p - cout)))
    s, b = _pack_affine(scale, bias, cout_p)
    return {"w": wt.astype(ACT_DTYPE), "scale": s, "bias": b, "cout_p": cout_p}


def init_params(key):
    """Deterministic synthetic ResNet-18 parameters, pre-packed for the kernels."""
    keys = iter(jax.random.split(key, 256))

    def conv_w(cout, cin, k):
        fan_in = cin * k * k
        return jax.random.normal(next(keys), (cout, cin, k, k),
                                 jnp.float32) * (2.0 / fan_in) ** 0.5

    def bn_p(c):
        k1, k2, k3, k4 = jax.random.split(next(keys), 4)
        gamma = 1.0 + 0.1 * jax.random.normal(k1, (c,), jnp.float32)
        beta = 0.1 * jax.random.normal(k2, (c,), jnp.float32)
        mean = 0.1 * jax.random.normal(k3, (c,), jnp.float32)
        var = 1.0 + 0.1 * jax.random.uniform(k4, (c,), jnp.float32)
        return _bn_fold(gamma, beta, mean, var)

    def cp(c):
        return _round_up(c, 128)

    s1, b1 = bn_p(64)
    params = {
        "conv1": _pack_conv7x7(conv_w(64, 3, 7), s1, b1,
                               cout_p=cp(64), k_p=_round_up(7 * 7 * 3, 128)),
        "layers": [],
    }
    inplanes = 64
    for planes, blocks, stride in [(64, 2, 1), (128, 2, 2), (256, 2, 2), (512, 2, 2)]:
        layer = []
        for bidx in range(blocks):
            s = stride if bidx == 0 else 1
            sc1, bi1 = bn_p(planes)
            sc2, bi2 = bn_p(planes)
            blk = {
                "c1": _pack_conv3x3(conv_w(planes, inplanes, 3), sc1, bi1,
                                    cp(inplanes), cp(planes)),
                "c2": _pack_conv3x3(conv_w(planes, planes, 3), sc2, bi2,
                                    cp(planes), cp(planes)),
            }
            if s != 1 or inplanes != planes:       # transition block: downsample
                scd, bid = bn_p(planes)
                blk["down"] = _pack_conv1x1(conv_w(planes, inplanes, 1), scd, bid,
                                            cp(inplanes), cp(planes))
            layer.append(blk)
            inplanes = planes
        params["layers"].append(layer)
    return params


# ----------------------------- Forward -----------------------------

def resnet18_forward(x_nchw, params):
    # NCHW -> NHWC, bf16 activations throughout (f32 accumulate in-kernel).
    x = jnp.transpose(x_nchw, (0, 2, 3, 1)).astype(ACT_DTYPE)

    x = conv1_7x7_bn_relu(x, params["conv1"])       # 64 (padded to 128) channels
    x = maxpool_3x3_s2_p1(x)

    for layer in params["layers"]:
        for blk in layer:
            if "down" in blk:
                # transition block: 3x3 s2 conv, then 3x3 s1 conv with the
                # 1x1 s2 downsample + BN + add + ReLU fused into its epilogue.
                out, x_ds = conv3x3_s2(x, blk["c1"])
                x = conv3x3_s1(out, blk["c2"], down=(x_ds, blk["down"]))
            else:
                out = conv3x3_s1(x, blk["c1"], relu=True)
                x = conv3x3_s1(out, blk["c2"], residual=x)

    x = avgpool_global(x)          # (N, 512) f32 (512 is already lane-aligned)
    return jnp.squeeze(x)          # matches torch.squeeze on (N,512,1,1)


# ----------------------------- Main -----------------------------

if __name__ == "__main__":
    key = jax.random.PRNGKey(0)
    kx, kp = jax.random.split(key)
    # Small input consistent with a 3-channel image backbone:
    # 32x32 -> conv1/maxpool -> 8x8 -> layer2..4 -> 1x1 -> (2, 512) features.
    x = jax.random.normal(kx, (2, 3, 32, 32), jnp.float32)
    params = init_params(kp)

    feats = resnet18_forward(x, params)
    feats = jax.block_until_ready(feats)
    assert feats.shape == (2, 512), feats.shape
    assert bool(jnp.all(jnp.isfinite(feats)))
    print("KERNEL_OK")
</pallas_src>

<mosaic_0001>
module attributes {stable_mosaic.version = 11 : i64} {
  func.func @_gemm_bn_kernel(%arg0: i32, %arg1: i32, %arg2: memref<256x256xbf16, #tpu.memory_space<vmem>>, %arg3: memref<256x128xbf16, #tpu.memory_space<vmem>>, %arg4: memref<1x128xf32, #tpu.memory_space<vmem>>, %arg5: memref<1x128xf32, #tpu.memory_space<vmem>>, %arg6: memref<256x128xbf16, #tpu.memory_space<vmem>>) attributes {dimension_semantics = [#tpu.dimension_semantics<parallel>, #tpu.dimension_semantics<parallel>], iteration_bounds = array<i64: 2, 1>, scalar_prefetch = 0 : i64, scratch_operands = 0 : i64, tpu.core_type = #tpu.core_type<tc>, window_params = [{transform_indices = @transform_0, window_bounds = array<i64: 256, 256>}, {transform_indices = @transform_1, window_bounds = array<i64: 256, 128>}, {transform_indices = @transform_2, window_bounds = array<i64: 1, 128>}, {transform_indices = @transform_3, window_bounds = array<i64: 1, 128>}, {transform_indices = @transform_4, window_bounds = array<i64: 256, 128>}]} {
    %c0 = arith.constant 0 : index
    %c0_0 = arith.constant 0 : index
    %0 = vector.load %arg2[%c0, %c0_0] : memref<256x256xbf16, #tpu.memory_space<vmem>>, vector<256x256xbf16>
    %c0_1 = arith.constant 0 : index
    %c0_2 = arith.constant 0 : index
    %1 = vector.load %arg3[%c0_1, %c0_2] : memref<256x128xbf16, #tpu.memory_space<vmem>>, vector<256x128xbf16>
    %cst = arith.constant dense<0.000000e+00> : vector<256x128xf32>
    %2 = tpu.matmul %0, %1, %cst {dimension_numbers = #tpu.dot_dimension_numbers<[1], [0], [0], [1], [0, 0, 1, 1], [], []>} : vector<256x256xbf16>, vector<256x128xbf16>, vector<256x128xf32> -> vector<256x128xf32>
    %c0_3 = arith.constant 0 : index
    %c0_4 = arith.constant 0 : index
    %3 = vector.load %arg4[%c0_3, %c0_4] : memref<1x128xf32, #tpu.memory_space<vmem>>, vector<1x128xf32>
    %4 = vector.broadcast %3 : vector<1x128xf32> to vector<256x128xf32>
    %5 = arith.mulf %2, %4 : vector<256x128xf32>
    %c0_5 = arith.constant 0 : index
    %c0_6 = arith.constant 0 : index
    %6 = vector.load %arg5[%c0_5, %c0_6] : memref<1x128xf32, #tpu.memory_space<vmem>>, vector<1x128xf32>
    %7 = vector.broadcast %6 : vector<1x128xf32> to vector<256x128xf32>
    %8 = arith.addf %5, %7 : vector<256x128xf32>
    %cst_7 = arith.constant 0.000000e+00 : f32
    %9 = vector.broadcast %cst_7 : f32 to vector<256x128xf32>
    %10 = arith.maximumf %8, %9 : vector<256x128xf32>
    %11 = arith.truncf %10 : vector<256x128xf32> to vector<256x128xbf16>
    %c0_8 = arith.constant 0 : index
    %c0_9 = arith.constant 0 : index
    %12 = vector.load %arg6[%c0_8, %c0_9] : memref<256x128xbf16, #tpu.memory_space<vmem>>, vector<256x128xbf16>
    tpu.vector_store %arg6[%c0_8, %c0_9], %11 {strides = array<i32>} : memref<256x128xbf16, #tpu.memory_space<vmem>>, vector<256x128xbf16>,
    return
  }
  func.func @transform_0(%arg0: i32, %arg1: i32) -> (i32, i32) {
    %c0_i32 = arith.constant 0 : i32
    %c0_i32_0 = arith.constant 0 : i32
    return %arg0, %c0_i32 : i32, i32
  }
  func.func @transform_1(%arg0: i32, %arg1: i32) -> (i32, i32) {
    %c0_i32 = arith.constant 0 : i32
    %c0_i32_0 = arith.constant 0 : i32
    return %c0_i32, %arg1 : i32, i32
  }
  func.func @transform_2(%arg0: i32, %arg1: i32) -> (i32, i32) {
    %c0_i32 = arith.constant 0 : i32
    %c0_i32_0 = arith.constant 0 : i32
    return %c0_i32, %arg1 : i32, i32
  }
  func.func @transform_3(%arg0: i32, %arg1: i32) -> (i32, i32) {
    %c0_i32 = arith.constant 0 : i32
    %c0_i32_0 = arith.constant 0 : i32
    return %c0_i32, %arg1 : i32, i32
  }
  func.func @transform_4(%arg0: i32, %arg1: i32) -> (i32, i32) {
    %c0_i32 = arith.constant 0 : i32
    return %arg0, %arg1 : i32, i32
  }
}

</mosaic_0001>

<bundles_post_ra>
// kernel: tpu_custom_call.1
= control target key start
LH: loop header
LB: loop body
LE: loop exit
PB: predicated region body
PF: predicated region fallthrough
CT: control target
= control target key end

     0   :  { %s2155_s0 = inlined_call_operand.hbm [shape: bf16[512,256], index: 0, kind: input, shape index: {}]   ;;  %s2156_s1 = inlined_call_operand.hbm [shape: bf16[256,128], index: 1, kind: input, shape index: {}]   ;;  %s2157_s2 = inlined_call_operand.vmem [shape: f32[1,128], index: 2, kind: input, shape index: {}]   ;;  %s2158_s3 = inlined_call_operand.vmem [shape: f32[1,128], index: 3, kind: input, shape index: {}]   ;;  %s2159_s4 = inlined_call_operand.hbm [shape: bf16[512,128], index: 4, kind: output, shape index: {}]  }
   0x1   :  { %2161 = sst [smem:[#allocation11_spill]] %s2156_s1 }
   0x2   :  { %9 = vsyncpa [#allocation3], 0 }
   0x3   :  { %11 = vsyncpa [#allocation3 + $0x1], 0 }
   0x4   :  { %12 = vsyncpa [#allocation6], 0 }
   0x5   :  { %13 = vsyncpa [#allocation4], 0 }
   0x6   :  { %15 = vsyncpa [#allocation4 + $0x1], 0  ;;  %s1846_s15 = smov 0   ;;  %s1848_s16 = smov 0  }
   0x7   :  { %s1850_s17 = smov 0   ;;  %s1852_s18 = smov 0  }
   0x8   :  { %s1854_s19 = smov 0   ;;  %s1856_s20 = smov 0  }
   0x9 LB: > { %s1169_s21 = sadd.s32 4294967295, %s1810_s20   ;;  %s1170_s22 = sadd.s32 4294967294, %s1810_s20   ;;  %s1810_s20 = sphi %s1856_s20, %s21_s20   ;;  %s1806_s19 = sphi %s1854_s19, %s2179_s19   ;;  %s1802_s18 = sphi %s1852_s18, %s2178_s18   ;;  %s1798_s17 = sphi %s1850_s17, %s2177_s17   ;;  %s1794_s16 = sphi %s1848_s16, %s2176_s16   ;;  %s1790_s15 = sphi %s1846_s15, %s2175_s15  }
   0xa   : > { %p53_p0 = scmp.ne.s32.totalorder %s1794_s16, %s1790_s15  ;;  %p1880_p1 = scmp.eq.s32.totalorder %s1169_s21, 0 }
   0xb   : > { %p1884_p2 = scmp.eq.s32.totalorder %s1169_s21, 1  ;;  %p163_p3 = scmp.eq.s32.totalorder %s1170_s22, 1 }
   0xc   : > { %p1890_p4 = por %p1880_p1, %p53_p0  ;;  %p1171_p5 = scmp.ge.s32.totalorder %s1810_s20, 1 }
   0xd   : > { %p1895_p6 = por %p163_p3, %p53_p0  ;;  %p170_p7 = scmp.lt.s32.totalorder %s1810_s20, 3 }
   0xe   : > { %s2164_s25 = scalar_select %p1890_p4, 1, 0 }
   0xf   : > { %s2165_s26 = scalar_select %p1895_p6, 1, 0 }
  0x10   : > { %p1900_p8 = pnand %p1171_p5, %p170_p7  ;;  %s1812_s28 = smov [#allocation5]  }
  0x11   : > { %s184_s29 = sshll.u32 %s1812_s28, 4  ;;  %s33_s5 = sadd.s32 1, %s1806_s19  ;;  %s185_s29 = int_to_ptr.vmem [resolvable:$true] %s184_s29 }
  0x12   : > { %p1537_p9 = pneg %p1900_p8  ;;  %s1683_s6 = scalar_lea.vmem %s185_s29, 2048 }
  0x13   : > { %p1684_p13 = scmp.ne.s32.totalorder %s185_s29, %s1683_s6  ;;  %p1691_p5 = scmp.lt.s32.totalorder %s185_s29, %s185_s29 }
  0x14   : > { %p1909_p11 = pnand %p1537_p9, %p1880_p1  ;;  %p1692_p7 = scmp.lt.s32.totalorder %s1683_s6, %s1683_s6 }
  0x16   : > { %p1674_p12 = pneg %p1909_p11  ;;  %p1693_p6 = por %p1692_p7, %p1691_p5 }
  0x18   : > { %p1686_p0 = pnand %p1684_p13, %p1674_p12 }
  0x1a   : > { %p1687_p3 = pneg %p1686_p0 }
  0x1c   : > { %p1694_p4 = pnand %p1693_p6, %p1687_p3 }
  0x1e   : > { %1697 = shalt.err (!%p1694_p4)
}
  0x1f   : > { %s1813_s7 = smov 64   ;;  %s1814_s8 = smov 4  }
  0x20   : > { %s2168_s1 = sld [smem:[#allocation11_spill]]  ;;  %p35_p6 = scmp.ge.s32.totalorder %s33_s5, 2 }
  0x21   : > { %s40_s11 = sadd.s32 1, %s1798_s17  ;;  %p47_p4 = scmp.ne.s32.totalorder %s1798_s17, %s1794_s16 }
  0x22   : > { %p48_p9 = scmp.eq.s32.totalorder %s1810_s20, 0  ;;  %s2181_s5 = smov (%p35_p6, %s33_s5), 0 }
  0x23   : > { %p1933_p13 = por %p1884_p2, %p47_p4  ;;  %s37_s14 = ssub.s32 %s1806_s19, %s2181_s5 }
  0x24   : > { %p1927_p12 = por %p48_p9, %p47_p4  ;;  %p1550_p0 = scmp.lt.s32.totalorder %s1810_s20, 2 }
  0x25   : > { %s210_s21 = sand.u32 1, %s1798_s17  }
  0x26   : > { %1540 = dma.hbm_to_vmem [thread:$0]  (!%p1909_p11), %s2168_s1, 2048, %s185_s29, [#allocation6], %s1813_s7, %s1813_s7, %s1814_s8  }
  0x27   : > { %p38_p11 = scmp.eq.s32.totalorder %s37_s14, 0  ;;  %s1176_s22 = sshll.u32 %s210_s21, 8 }
  0x28   : > { %s1272_s29 = sshll.u32 %s1806_s19, 12  ;;  %s214_s8 = scalar_lea.vmem [#allocation2], %s1176_s22 }
  0x29   : > { %s1942_s28 = scalar_select %p38_p11, %s1798_s17, %s40_s11  }
  0x2a   : > { %s221_s7 = scalar_lea.hbm %s2155_s0, %s1272_s29  ;;  %s222_s9 = sshll.u32 %s214_s8, 4  ;;  %s223_s9 = int_to_ptr.vmem [resolvable:$true] %s222_s9 }
  0x2b   : > { %p1950_p2 = pnand %p1550_p0, %p1927_p12  ;;  %s211_s10 = scalar_lea.sflag [#allocation3], %s210_s21 }
  0x2c   : > { %s1711_s14 = scalar_lea.vmem %s223_s9, 4096  ;;  %s1815_s11 = smov [#allocation2]  }
  0x2d   : > { %p1700_p3 = pneg %p1950_p2  ;;  %p1712_p5 = scmp.ne.s32.totalorder %s223_s9, %s1711_s14 }
  0x2e   : > { %s1716_s1 = sshll.u32 %s1815_s11, 4  ;;  %s1717_s1 = int_to_ptr.vmem [resolvable:$false] %s1716_s1 }
  0x2f   : > { %p1714_p7 = pnand %p1712_p5, %p1700_p3  ;;  %s1718_s29 = scalar_lea.vmem %s1717_s1, 8192 }
  0x30   : > { %p1719_p4 = scmp.lt.s32.totalorder %s223_s9, %s1717_s1  ;;  %p1720_p9 = scmp.lt.s32.totalorder %s1718_s29, %s1711_s14 }
  0x31   : > { %p1715_p6 = pneg %p1714_p7 }
  0x32   : > { %p1721_p11 = por %p1720_p9, %p1719_p4 }
  0x34   : > { %p1722_p10 = pnand %p1721_p11, %p1715_p6 }
  0x36   : > { %1725 = shalt.err (!%p1722_p10)
}
  0x37   : > { %s1816_s12 = smov 128   ;;  %s1817_s22 = smov 8  }
  0x38   : > { %1544 = dma.hbm_to_vmem [thread:$0]  (!%p1950_p2), %s221_s7, 4096, %s223_s9, %s211_s10, %s1816_s12, %s1816_s12, %s1817_s22  }
  0x39   : > { %234 = sbr.rel (%p1900_p8) target bundleno = 377 (0x179), region = 36  ;;  %s1961_s21 = sand.u32 (!%p1900_p8), 1, %s1794_s16  }
  0x3a   : > { %s1181_s30 = sshll.u32 (!%p1900_p8), %s1961_s21, 8  ;;  %s237_s1 = scalar_lea.sflag (!%p1900_p8), [#allocation3], %s1961_s21 }
  0x3b   : > { %s1965_s6 = scalar_lea.vmem (!%p1900_p8), [#allocation2], %s1181_s30  ;;  %p2172_p12 = scmp.ne.s32.totalorder (!%p1900_p8), %s2164_s25, 0 }
  0x3e   : > { %1777 = dma.done.wait (%p2172_p12), %s237_s1, 4096  }
  0x3f   : > { %1779 = vsyncadd (%p2172_p12), %s237_s1, 4294963200 }
  0x40   : > { %1781 = dma.done.wait (%p1880_p1), [#allocation6], 2048  }
  0x41   : > { %1783 = vsyncadd (%p1880_p1), [#allocation6], 4294965248  ;;  %v1608_v0 = vld [vmem:[#allocation5 + $0x78] sm:$0xff]   ;;  %v1610_v2 = vld [vmem:[#allocation5 + $0x70] sm:$0xff]   ;;  %s1183_s8 = sshll.u32 %s1961_s21, 7  ;;  %s1305_s24 = sshll.u32 %s1802_s18, 11 }
  0x42   : > { %v1609_v1 = vld [vmem:[#allocation5 + $0x38] sm:$0xff]   ;;  %1401 = vmatprep.subr.bf16.mxu0 %v1608_v0  ;;  %1513 = vmatprep.subr.bf16.mxu1 %v1608_v0  ;;  %v1611_v3 = vld [vmem:[#allocation5 + $0x30] sm:$0xff]   ;;  %v1612_v4 = vld [vmem:[#allocation5 + $0x68] sm:$0xff]   ;;  %s2028_s9 = scalar_lea.vmem [#allocation7], %s1183_s8  ;;  %s2103_s29 = scalar_lea.hbm %s2159_s4, %s1305_s24 }
  0x43   : > { %1402 = vmatpush3.bf16.msra.mxu0 %v1609_v1  ;;  %1521 = vmatpush3.bf16.msra.mxu1 %v1609_v1  ;;  %v1613_v5 = vld [vmem:[#allocation5 + $0x28] sm:$0xff]   ;;  %v1614_v6 = vld [vmem:[#allocation5 + $0x60] sm:$0xff]   ;;  %v1616_v8 = vld [vmem:[#allocation5 + $0x58] sm:$0xff]   ;;  %s1050_s10 = sshll.u32 %s2028_s9, 4  ;;  %s1036_s18 = scalar_lea.sflag [#allocation4], %s1961_s21  ;;  %s2105_s10 = int_to_ptr.vmem [resolvable:$true] %s1050_s10 }
  0x44   : > { %1403 = vmatprep.subr.bf16.mxu0 %v1610_v2  ;;  %1514 = vmatprep.subr.bf16.mxu1 %v1610_v2  ;;  %v1615_v7 = vld [vmem:[#allocation5 + $0x20] sm:$0xff]   ;;  %v1617_v9 = vld [vmem:[#allocation5 + $0x18] sm:$0xff]   ;;  %v1618_v10 = vld [vmem:[#allocation5 + $0x50] sm:$0xff]   ;;  %s1726_s12 = scalar_lea.vmem %s2105_s10, 2048  ;;  %s1818_s22 = smov [#allocation7]  }
  0x45   : > { %v1626_v11 = vld [vmem:[%s1965_s6 + $0x4] ss:$8 sps:$4 sm:$0xff]   ;;  %v1619_v13 = vld [vmem:[#allocation5 + $0x10] sm:$0xff]   ;;  %v1624_v18 = vld [vmem:[%s1965_s6] ss:$8 sps:$4 sm:$0xff]   ;;  %p1727_p1 = scmp.ne.s32.totalorder %s2105_s10, %s1726_s12  ;;  %s1730_s30 = sshll.u32 %s1818_s22, 4  ;;  %s1731_s30 = int_to_ptr.vmem [resolvable:$false] %s1730_s30 }
  0x46   : > { %v1629_v12 = vld [vmem:[%s1965_s6 + $0x84] ss:$8 sps:$4 sm:$0xff]   ;;  %636 = vmatprep.mubr.bf16.mxu0 %v1626_v11  ;;  %v1627_v19 = vld [vmem:[%s1965_s6 + $0x80] ss:$8 sps:$4 sm:$0xff]   ;;  %v1630_v20 = vld [vmem:[%s1965_s6 + $0x14] ss:$8 sps:$4 sm:$0xff]   ;;  %p1733_p0 = scmp.lt.s32.totalorder %s2105_s10, %s1731_s30 }
  0x47   : > { %1404 = vmatpush3.bf16.msra.mxu0 %v1611_v3  ;;  %1522 = vmatpush3.bf16.msra.mxu1 %v1611_v3  ;;  %v1620_v14 = vld [vmem:[#allocation5 + $0x48] sm:$0xff]   ;;  %v1622_v16 = vld [vmem:[#allocation5 + $0x40] sm:$0xff]   ;;  %v1632_v21 = vld [vmem:[%s1965_s6 + $0x94] ss:$8 sps:$4 sm:$0xff]   ;;  %p1728_p8 = pnand %p1727_p1, %p1933_p13  ;;  %s1732_s1 = scalar_lea.vmem %s1731_s30, 4096 }
  0x48   : > { %1405 = vmatprep.subr.bf16.mxu0 %v1612_v4  ;;  %1515 = vmatprep.subr.bf16.mxu1 %v1612_v4  ;;  %v1621_v15 = vld [vmem:[#allocation5 + $0x8] sm:$0xff]   ;;  %v1623_v17 = vld [vmem:[#allocation5] sm:$0xff]   ;;  %v1634_v22 = vld [vmem:[%s1965_s6 + $0x10] ss:$8 sps:$4 sm:$0xff]   ;;  %p1734_p2 = scmp.lt.s32.totalorder %s1732_s1, %s1726_s12 }
  0x49   : > { %700 = vmatprep.mubr.bf16.mxu1 %v1629_v12  ;;  %v1635_v23 = vld [vmem:[%s1965_s6 + $0x90] ss:$8 sps:$4 sm:$0xff]   ;;  %v1636_v24 = vld [vmem:[%s1965_s6 + $0x24] ss:$8 sps:$4 sm:$0xff]   ;;  %v1640_v26 = vld [vmem:[%s1965_s6 + $0x20] ss:$8 sps:$4 sm:$0xff]   ;;  %p1729_p10 = pneg %p1728_p8 }
  0x4a   : > { %v1638_v25 = vld [vmem:[%s1965_s6 + $0xa4] ss:$8 sps:$4 sm:$0xff]   ;;  %v1641_v27 = vld [vmem:[%s1965_s6 + $0xa0] ss:$8 sps:$4 sm:$0xff]   ;;  %v1642_v28 = vld [vmem:[%s1965_s6 + $0x34] ss:$8 sps:$4 sm:$0xff]   ;;  %p1735_p3 = por %p1734_p2, %p1733_p0 }
  0x4b   : > { %1406 = vmatpush3.bf16.msra.mxu0 %v1613_v5  ;;  %1523 = vmatpush3.bf16.msra.mxu1 %v1613_v5  ;;  %v1644_v29 = vld [vmem:[%s1965_s6 + $0xb4] ss:$8 sps:$4 sm:$0xff]   ;;  %v1646_v30 = vld [vmem:[%s1965_s6 + $0x30] ss:$8 sps:$4 sm:$0xff]   ;;  %v1648_v32 = vld [vmem:[%s1965_s6 + $0x44] ss:$8 sps:$4 sm:$0xff]  }
  0x4c   : > { %1407 = vmatprep.subr.bf16.mxu0 %v1614_v6  ;;  %1516 = vmatprep.subr.bf16.mxu1 %v1614_v6  ;;  %v1647_v31 = vld [vmem:[%s1965_s6 + $0xb0] ss:$8 sps:$4 sm:$0xff]   ;;  %v1650_v33 = vld [vmem:[%s1965_s6 + $0xc4] ss:$8 sps:$4 sm:$0xff]   ;;  %v1652_v34 = vld [vmem:[%s1965_s6 + $0x40] ss:$8 sps:$4 sm:$0xff]   ;;  %p1736_p5 = pnand %p1735_p3, %p1729_p10 }
  0x4d   : > { %v1653_v35 = vld [vmem:[%s1965_s6 + $0xc0] ss:$8 sps:$4 sm:$0xff]   ;;  %v1654_v36 = vld [vmem:[%s1965_s6 + $0x54] ss:$8 sps:$4 sm:$0xff]   ;;  %v1658_v38 = vld [vmem:[%s1965_s6 + $0x50] ss:$8 sps:$4 sm:$0xff]  }
  0x4e   : > { %v1656_v37 = vld [vmem:[%s1965_s6 + $0xd4] ss:$8 sps:$4 sm:$0xff]   ;;  %v1659_v39 = vld [vmem:[%s1965_s6 + $0xd0] ss:$8 sps:$4 sm:$0xff]   ;;  %v1660_v40 = vld [vmem:[%s1965_s6 + $0x64] ss:$8 sps:$4 sm:$0xff]  }
  0x4f   : > { %1408 = vmatpush3.bf16.msra.mxu0 %v1615_v7  ;;  %1524 = vmatpush3.bf16.msra.mxu1 %v1615_v7  ;;  %v1662_v41 = vld [vmem:[%s1965_s6 + $0xe4] ss:$8 sps:$4 sm:$0xff]   ;;  %v1664_v42 = vld [vmem:[%s1965_s6 + $0x60] ss:$8 sps:$4 sm:$0xff]   ;;  %v1666_v44 = vld [vmem:[%s1965_s6 + $0x74] ss:$8 sps:$4 sm:$0xff]  }
  0x50   : > { %1409 = vmatprep.subr.bf16.mxu0 %v1616_v8  ;;  %1517 = vmatprep.subr.bf16.mxu1 %v1616_v8  ;;  %v1665_v43 = vld [vmem:[%s1965_s6 + $0xe0] ss:$8 sps:$4 sm:$0xff]   ;;  %v1668_v45 = vld [vmem:[%s1965_s6 + $0xf4] ss:$8 sps:$4 sm:$0xff]   ;;  %v1670_v46 = vld [vmem:[%s1965_s6 + $0x70] ss:$8 sps:$4 sm:$0xff]  }
  0x51   : > { %v1671_v47 = vld [vmem:[%s1965_s6 + $0xf0] ss:$8 sps:$4 sm:$0xff]   ;;  %v2010_v51 = vld [vmem:[%s2157_s2] ss:$0 sm:$0xff] }
  0x52   : > { %v2017_v59 = vld [vmem:[%s2158_s3] ss:$0 sm:$0xff] }
  0x53   : > { %1410 = vmatpush3.bf16.msra.mxu0 %v1617_v9  ;;  %1525 = vmatpush3.bf16.msra.mxu1 %v1617_v9 }
  0x54   : > { %1411 = vmatprep.subr.bf16.mxu0 %v1618_v10  ;;  %1518 = vmatprep.subr.bf16.mxu1 %v1618_v10 }
  0x57   : > { %1412 = vmatpush3.bf16.msra.mxu0 %v1619_v13  ;;  %1526 = vmatpush3.bf16.msra.mxu1 %v1619_v13 }
  0x58   : > { %1413 = vmatprep.subr.bf16.mxu0 %v1620_v14  ;;  %1519 = vmatprep.subr.bf16.mxu1 %v1620_v14 }
  0x5b   : > { %1414 = vmatpush3.bf16.msra.mxu0 %v1621_v15  ;;  %1527 = vmatpush3.bf16.msra.mxu1 %v1621_v15 }
  0x5c   : > { %1415 = vmatprep.subr.bf16.mxu0 %v1622_v16  ;;  %1520 = vmatprep.subr.bf16.mxu1 %v1622_v16 }
  0x5f   : > { %1416 = vmatpush3.bf16.msra.mxu0 %v1623_v17  ;;  %1528 = vmatpush3.bf16.msra.mxu1 %v1623_v17 }
  0x62   : > { %637 = vmatmul.mubr.bf16.vlgmr.msra.gmra.mxu0 %v1624_v18  ;;  %701 = vmatmul.mubr.bf16.vlgmr.msra.gmra.mxu1 %v1627_v19 }
  0x63   : > { %644 = vmatprep.mubr.bf16.mxu0 %v1630_v20  ;;  %708 = vmatprep.mubr.bf16.mxu1 %v1632_v21 }
  0x6a   : > { %645 = vmatmul.mubr.bf16.gmra.mxu0 %v1634_v22  ;;  %709 = vmatmul.mubr.bf16.gmra.mxu1 %v1635_v23 }
  0x6b   : > { %652 = vmatprep.mubr.bf16.mxu0 %v1636_v24  ;;  %716 = vmatprep.mubr.bf16.mxu1 %v1638_v25 }
  0x72   : > { %653 = vmatmul.mubr.bf16.gmra.mxu0 %v1640_v26  ;;  %717 = vmatmul.mubr.bf16.gmra.mxu1 %v1641_v27 }
  0x73   : > { %660 = vmatprep.mubr.bf16.mxu0 %v1642_v28  ;;  %724 = vmatprep.mubr.bf16.mxu1 %v1644_v29 }
  0x7a   : > { %661 = vmatmul.mubr.bf16.gmra.mxu0 %v1646_v30  ;;  %725 = vmatmul.mubr.bf16.gmra.mxu1 %v1647_v31 }
  0x7b   : > { %668 = vmatprep.mubr.bf16.mxu0 %v1648_v32  ;;  %732 = vmatprep.mubr.bf16.mxu1 %v1650_v33 }
  0x82   : > { %669 = vmatmul.mubr.bf16.gmra.mxu0 %v1652_v34  ;;  %733 = vmatmul.mubr.bf16.gmra.mxu1 %v1653_v35 }
  0x83   : > { %676 = vmatprep.mubr.bf16.mxu0 %v1654_v36  ;;  %740 = vmatprep.mubr.bf16.mxu1 %v1656_v37 }
  0x8a   : > { %677 = vmatmul.mubr.bf16.gmra.mxu0 %v1658_v38  ;;  %741 = vmatmul.mubr.bf16.gmra.mxu1 %v1659_v39 }
  0x8b   : > { %684 = vmatprep.mubr.bf16.mxu0 %v1660_v40  ;;  %748 = vmatprep.mubr.bf16.mxu1 %v1662_v41 }
  0x92   : > { %685 = vmatmul.mubr.bf16.gmra.mxu0 %v1664_v42  ;;  %749 = vmatmul.mubr.bf16.gmra.mxu1 %v1665_v43 }
  0x93   : > { %692 = vmatprep.mubr.bf16.mxu0 %v1666_v44  ;;  %756 = vmatprep.mubr.bf16.mxu1 %v1668_v45 }
  0x9a   : > { %693 = vmatmul.mubr.bf16.gmra.mxu0 %v1670_v46  ;;  %757 = vmatmul.mubr.bf16.gmra.mxu1 %v1671_v47 }
 0x122   : > { %v1417_v48 = vpop.f32.mrf.mxu0  ;;  %v1465_v49 = vpop.f32.mrf.mxu1 }
 0x124   : > { %v1418_v50 = vpop.f32.mrf.mxu0  ;;  %v1466_v52 = vpop.f32.mrf.mxu1 }
 0x125   : > { %v1419_v53 = vadd.f32 %v1418_v50, %v1417_v48  ;;  %v1467_v54 = vadd.f32 %v1466_v52, %v1465_v49 }
 0x126   : > { %v1420_v55 = vpop.f32.mrf.mxu0  ;;  %v1468_v56 = vpop.f32.mrf.mxu1 }
 0x127   : > { %v772_v57 = vmul.f32 %v1419_v53, %v2010_v51  ;;  %v788_v58 = vmul.f32 %v1467_v54, %v2010_v51 }
 0x128   : > { %v1421_v60 = vpop.f32.mrf.mxu0  ;;  %v1469_v61 = vpop.f32.mrf.mxu1 }
 0x129   : > { %v1422_v62 = vadd.f32 %v1421_v60, %v1420_v55  ;;  %v1470_v63 = vadd.f32 %v1469_v61, %v1468_v56  ;;  %v811_v2 = vadd.f32 %v2017_v59, %v772_v57  ;;  %v827_v3 = vadd.f32 %v2017_v59, %v788_v58 }
 0x12a   : > { %v1423_v0 = vpop.f32.mrf.mxu0  ;;  %v1471_v1 = vpop.f32.mrf.mxu1 }
 0x12b   : > { %v773_v4 = vmul.f32 %v1422_v62, %v2010_v51  ;;  %v789_v5 = vmul.f32 %v1470_v63, %v2010_v51  ;;  %v843_v14 = vmax.f32 %v811_v2, 0.0  ;;  %v859_v15 = vmax.f32 %v827_v3, 0.0 }
 0x12c   : > { %v1424_v6 = vpop.f32.mrf.mxu0  ;;  %v1472_v7 = vpop.f32.mrf.mxu1 }
 0x12d   : > { %v812_v8 = vadd.f32 %v2017_v59, %v773_v4  ;;  %v828_v9 = vadd.f32 %v2017_v59, %v789_v5  ;;  %v1425_v10 = vadd.f32 %v1424_v6, %v1423_v0  ;;  %v1473_v11 = vadd.f32 %v1472_v7, %v1471_v1 }
 0x12e   : > { %v1426_v12 = vpop.f32.mrf.mxu0  ;;  %v1474_v13 = vpop.f32.mrf.mxu1 }
 0x12f   : > { %v844_v16 = vmax.f32 %v812_v8, 0.0  ;;  %v860_v17 = vmax.f32 %v828_v9, 0.0  ;;  %v774_v18 = vmul.f32 %v1425_v10, %v2010_v51  ;;  %v790_v19 = vmul.f32 %v1473_v11, %v2010_v51 }
 0x130   : > { %v1427_v20 = vpop.f32.mrf.mxu0  ;;  %v1475_v21 = vpop.f32.mrf.mxu1 }
 0x131   : > { %v1309_v22 = vpack.c.bf16 %v844_v16, %v843_v14  ;;  %v1349_v23 = vpack.c.bf16 %v860_v17, %v859_v15  ;;  %v1428_v24 = vadd.f32 %v1427_v20, %v1426_v12  ;;  %v1476_v25 = vadd.f32 %v1475_v21, %v1474_v13 }
 0x132   : > { %v1429_v26 = vpop.f32.mrf.mxu0  ;;  %v1477_v27 = vpop.f32.mrf.mxu1  ;;  %v813_v28 = vadd.f32 %v2017_v59, %v774_v18  ;;  %v829_v29 = vadd.f32 %v2017_v59, %v790_v19 }
 0x133   : > { %1310 = vst [vmem:[%s2028_s9] sm:$0xff] %v1309_v22   ;;  %1393 = vst [vmem:[%s2028_s9 + $0x40] sm:$0xff] %v1349_v23   ;;  %v775_v30 = vmul.f32 %v1428_v24, %v2010_v51  ;;  %v791_v31 = vmul.f32 %v1476_v25, %v2010_v51 }
 0x134   : > { %v1430_v32 = vpop.f32.mrf.mxu0  ;;  %v1478_v33 = vpop.f32.mrf.mxu1  ;;  %v845_v42 = vmax.f32 %v813_v28, 0.0  ;;  %v861_v43 = vmax.f32 %v829_v29, 0.0 }
 0x135   : > { %v1431_v34 = vadd.f32 %v1430_v32, %v1429_v26  ;;  %v1479_v35 = vadd.f32 %v1478_v33, %v1477_v27  ;;  %v814_v36 = vadd.f32 %v2017_v59, %v775_v30  ;;  %v830_v37 = vadd.f32 %v2017_v59, %v791_v31 }
 0x136   : > { %v1432_v38 = vpop.f32.mrf.mxu0  ;;  %v1480_v39 = vpop.f32.mrf.mxu1 }
 0x137   : > { %v776_v40 = vmul.f32 %v1431_v34, %v2010_v51  ;;  %v792_v41 = vmul.f32 %v1479_v35, %v2010_v51  ;;  %v846_v44 = vmax.f32 %v814_v36, 0.0  ;;  %v862_v45 = vmax.f32 %v830_v37, 0.0 }
 0x138   : > { %v1433_v46 = vpop.f32.mrf.mxu0  ;;  %v1481_v47 = vpop.f32.mrf.mxu1 }
 0x139   : > { %v1434_v48 = vadd.f32 %v1433_v46, %v1432_v38  ;;  %v1482_v49 = vadd.f32 %v1481_v47, %v1480_v39  ;;  %v1314_v50 = vpack.c.bf16 %v846_v44, %v845_v42  ;;  %v1354_v52 = vpack.c.bf16 %v862_v45, %v861_v43 }
 0x13a   : > { %v1435_v53 = vpop.f32.mrf.mxu0  ;;  %v1483_v54 = vpop.f32.mrf.mxu1  ;;  %v815_v55 = vadd.f32 %v2017_v59, %v776_v40  ;;  %v831_v56 = vadd.f32 %v2017_v59, %v792_v41 }
 0x13b   : > { %v777_v57 = vmul.f32 %v1434_v48, %v2010_v51  ;;  %v793_v58 = vmul.f32 %v1482_v49, %v2010_v51  ;;  %1386 = vst [vmem:[%s2028_s9 + $0x8] sm:$0xff] %v1314_v50   ;;  %1394 = vst [vmem:[%s2028_s9 + $0x48] sm:$0xff] %v1354_v52  }
 0x13c   : > { %v1436_v60 = vpop.f32.mrf.mxu0  ;;  %v1484_v61 = vpop.f32.mrf.mxu1  ;;  %v847_v4 = vmax.f32 %v815_v55, 0.0  ;;  %v863_v5 = vmax.f32 %v831_v56, 0.0 }
 0x13d   : > { %v816_v62 = vadd.f32 %v2017_v59, %v777_v57  ;;  %v832_v63 = vadd.f32 %v2017_v59, %v793_v58  ;;  %v1437_v0 = vadd.f32 %v1436_v60, %v1435_v53  ;;  %v1485_v1 = vadd.f32 %v1484_v61, %v1483_v54 }
 0x13e   : > { %v1438_v2 = vpop.f32.mrf.mxu0  ;;  %v1486_v3 = vpop.f32.mrf.mxu1 }
 0x13f   : > { %v848_v6 = vmax.f32 %v816_v62, 0.0  ;;  %v864_v7 = vmax.f32 %v832_v63, 0.0  ;;  %v778_v8 = vmul.f32 %v1437_v0, %v2010_v51  ;;  %v794_v9 = vmul.f32 %v1485_v1, %v2010_v51 }
 0x140   : > { %v1439_v10 = vpop.f32.mrf.mxu0  ;;  %v1487_v11 = vpop.f32.mrf.mxu1 }
 0x141   : > { %v1319_v12 = vpack.c.bf16 %v848_v6, %v847_v4  ;;  %v1359_v13 = vpack.c.bf16 %v864_v7, %v863_v5  ;;  %v1440_v14 = vadd.f32 %v1439_v10, %v1438_v2  ;;  %v1488_v15 = vadd.f32 %v1487_v11, %v1486_v3 }
 0x142   : > { %v1441_v16 = vpop.f32.mrf.mxu0  ;;  %v1489_v17 = vpop.f32.mrf.mxu1  ;;  %v817_v18 = vadd.f32 %v2017_v59, %v778_v8  ;;  %v833_v19 = vadd.f32 %v2017_v59, %v794_v9 }
 0x143   : > { %1387 = vst [vmem:[%s2028_s9 + $0x10] sm:$0xff] %v1319_v12   ;;  %1395 = vst [vmem:[%s2028_s9 + $0x50] sm:$0xff] %v1359_v13   ;;  %v779_v20 = vmul.f32 %v1440_v14, %v2010_v51  ;;  %v795_v21 = vmul.f32 %v1488_v15, %v2010_v51 }
 0x144   : > { %v1442_v22 = vpop.f32.mrf.mxu0  ;;  %v1490_v23 = vpop.f32.mrf.mxu1  ;;  %v849_v32 = vmax.f32 %v817_v18, 0.0  ;;  %v865_v33 = vmax.f32 %v833_v19, 0.0 }
 0x145   : > { %v1443_v24 = vadd.f32 %v1442_v22, %v1441_v16  ;;  %v1491_v25 = vadd.f32 %v1490_v23, %v1489_v17  ;;  %v818_v26 = vadd.f32 %v2017_v59, %v779_v20  ;;  %v834_v27 = vadd.f32 %v2017_v59, %v795_v21 }
 0x146   : > { %v1444_v28 = vpop.f32.mrf.mxu0  ;;  %v1492_v29 = vpop.f32.mrf.mxu1 }
 0x147   : > { %v780_v30 = vmul.f32 %v1443_v24, %v2010_v51  ;;  %v796_v31 = vmul.f32 %v1491_v25, %v2010_v51  ;;  %v850_v34 = vmax.f32 %v818_v26, 0.0  ;;  %v866_v35 = vmax.f32 %v834_v27, 0.0 }
 0x148   : > { %v1445_v36 = vpop.f32.mrf.mxu0  ;;  %v1493_v37 = vpop.f32.mrf.mxu1 }
 0x149   : > { %v1446_v38 = vadd.f32 %v1445_v36, %v1444_v28  ;;  %v1494_v39 = vadd.f32 %v1493_v37, %v1492_v29  ;;  %v1324_v40 = vpack.c.bf16 %v850_v34, %v849_v32  ;;  %v1364_v41 = vpack.c.bf16 %v866_v35, %v865_v33 }
 0x14a   : > { %v1447_v42 = vpop.f32.mrf.mxu0  ;;  %v1495_v43 = vpop.f32.mrf.mxu1  ;;  %v819_v44 = vadd.f32 %v2017_v59, %v780_v30  ;;  %v835_v45 = vadd.f32 %v2017_v59, %v796_v31 }
 0x14b   : > { %v781_v46 = vmul.f32 %v1446_v38, %v2010_v51  ;;  %v797_v47 = vmul.f32 %v1494_v39, %v2010_v51  ;;  %1388 = vst [vmem:[%s2028_s9 + $0x18] sm:$0xff] %v1324_v40   ;;  %1396 = vst [vmem:[%s2028_s9 + $0x58] sm:$0xff] %v1364_v41  }
 0x14c   : > { %v1448_v48 = vpop.f32.mrf.mxu0  ;;  %v1496_v49 = vpop.f32.mrf.mxu1  ;;  %v851_v57 = vmax.f32 %v819_v44, 0.0  ;;  %v867_v58 = vmax.f32 %v835_v45, 0.0 }
 0x14d   : > { %v820_v50 = vadd.f32 %v2017_v59, %v781_v46  ;;  %v836_v52 = vadd.f32 %v2017_v59, %v797_v47  ;;  %v1449_v53 = vadd.f32 %v1448_v48, %v1447_v42  ;;  %v1497_v54 = vadd.f32 %v1496_v49, %v1495_v43 }
 0x14e   : > { %v1450_v55 = vpop.f32.mrf.mxu0  ;;  %v1498_v56 = vpop.f32.mrf.mxu1 }
 0x14f   : > { %v852_v60 = vmax.f32 %v820_v50, 0.0  ;;  %v868_v61 = vmax.f32 %v836_v52, 0.0  ;;  %v782_v62 = vmul.f32 %v1449_v53, %v2010_v51  ;;  %v798_v63 = vmul.f32 %v1497_v54, %v2010_v51 }
 0x150   : > { %v1451_v0 = vpop.f32.mrf.mxu0  ;;  %v1499_v1 = vpop.f32.mrf.mxu1 }
 0x151   : > { %v1329_v2 = vpack.c.bf16 %v852_v60, %v851_v57  ;;  %v1369_v3 = vpack.c.bf16 %v868_v61, %v867_v58  ;;  %v1452_v4 = vadd.f32 %v1451_v0, %v1450_v55  ;;  %v1500_v5 = vadd.f32 %v1499_v1, %v1498_v56 }
 0x152   : > { %v1453_v6 = vpop.f32.mrf.mxu0  ;;  %v1501_v7 = vpop.f32.mrf.mxu1  ;;  %v821_v8 = vadd.f32 %v2017_v59, %v782_v62  ;;  %v837_v9 = vadd.f32 %v2017_v59, %v798_v63 }
 0x153   : > { %1389 = vst [vmem:[%s2028_s9 + $0x20] sm:$0xff] %v1329_v2   ;;  %1397 = vst [vmem:[%s2028_s9 + $0x60] sm:$0xff] %v1369_v3   ;;  %v783_v10 = vmul.f32 %v1452_v4, %v2010_v51  ;;  %v799_v11 = vmul.f32 %v1500_v5, %v2010_v51 }
 0x154   : > { %v1454_v12 = vpop.f32.mrf.mxu0  ;;  %v1502_v13 = vpop.f32.mrf.mxu1  ;;  %v853_v22 = vmax.f32 %v821_v8, 0.0  ;;  %v869_v23 = vmax.f32 %v837_v9, 0.0 }
 0x155   : > { %v1455_v14 = vadd.f32 %v1454_v12, %v1453_v6  ;;  %v1503_v15 = vadd.f32 %v1502_v13, %v1501_v7  ;;  %v822_v16 = vadd.f32 %v2017_v59, %v783_v10  ;;  %v838_v17 = vadd.f32 %v2017_v59, %v799_v11 }
 0x156   : > { %v1456_v18 = vpop.f32.mrf.mxu0  ;;  %v1504_v19 = vpop.f32.mrf.mxu1 }
 0x157   : > { %v784_v20 = vmul.f32 %v1455_v14, %v2010_v51  ;;  %v800_v21 = vmul.f32 %v1503_v15, %v2010_v51  ;;  %v854_v24 = vmax.f32 %v822_v16, 0.0  ;;  %v870_v25 = vmax.f32 %v838_v17, 0.0 }
 0x158   : > { %v1457_v26 = vpop.f32.mrf.mxu0  ;;  %v1505_v27 = vpop.f32.mrf.mxu1 }
 0x159   : > { %v1458_v28 = vadd.f32 %v1457_v26, %v1456_v18  ;;  %v1506_v29 = vadd.f32 %v1505_v27, %v1504_v19  ;;  %v1334_v30 = vpack.c.bf16 %v854_v24, %v853_v22  ;;  %v1374_v31 = vpack.c.bf16 %v870_v25, %v869_v23 }
 0x15a   : > { %v1459_v32 = vpop.f32.mrf.mxu0  ;;  %v1507_v33 = vpop.f32.mrf.mxu1  ;;  %v823_v34 = vadd.f32 %v2017_v59, %v784_v20  ;;  %v839_v35 = vadd.f32 %v2017_v59, %v800_v21 }
 0x15b   : > { %v785_v36 = vmul.f32 %v1458_v28, %v2010_v51  ;;  %v801_v37 = vmul.f32 %v1506_v29, %v2010_v51  ;;  %1390 = vst [vmem:[%s2028_s9 + $0x28] sm:$0xff] %v1334_v30   ;;  %1398 = vst [vmem:[%s2028_s9 + $0x68] sm:$0xff] %v1374_v31  }
 0x15c   : > { %v1460_v38 = vpop.f32.mrf.mxu0  ;;  %v1508_v39 = vpop.f32.mrf.mxu1  ;;  %v855_v46 = vmax.f32 %v823_v34, 0.0  ;;  %v871_v47 = vmax.f32 %v839_v35, 0.0 }
 0x15d   : > { %v824_v40 = vadd.f32 %v2017_v59, %v785_v36  ;;  %v840_v41 = vadd.f32 %v2017_v59, %v801_v37  ;;  %v1461_v42 = vadd.f32 %v1460_v38, %v1459_v32  ;;  %v1509_v43 = vadd.f32 %v1508_v39, %v1507_v33 }
 0x15e   : > { %v1462_v44 = vpop.f32.mrf.mxu0  ;;  %v1510_v45 = vpop.f32.mrf.mxu1 }
 0x15f   : > { %v856_v48 = vmax.f32 %v824_v40, 0.0  ;;  %v872_v49 = vmax.f32 %v840_v41, 0.0  ;;  %v786_v50 = vmul.f32 %v1461_v42, %v2010_v51  ;;  %v802_v52 = vmul.f32 %v1509_v43, %v2010_v51 }
 0x160   : > { %v1463_v53 = vpop.f32.mrf.mxu0  ;;  %v1511_v54 = vpop.f32.mrf.mxu1 }
 0x161   : > { %v1339_v55 = vpack.c.bf16 %v856_v48, %v855_v46  ;;  %v1379_v56 = vpack.c.bf16 %v872_v49, %v871_v47  ;;  %v1464_v57 = vadd.f32 %v1463_v53, %v1462_v44  ;;  %v1512_v58 = vadd.f32 %v1511_v54, %v1510_v45 }
 0x162   : > { %v825_v60 = vadd.f32 %v2017_v59, %v786_v50  ;;  %v841_v61 = vadd.f32 %v2017_v59, %v802_v52 }
 0x163   : > { %1391 = vst [vmem:[%s2028_s9 + $0x30] sm:$0xff] %v1339_v55   ;;  %1399 = vst [vmem:[%s2028_s9 + $0x70] sm:$0xff] %v1379_v56   ;;  %v787_v62 = vmul.f32 %v1464_v57, %v2010_v51  ;;  %v803_v63 = vmul.f32 %v1512_v58, %v2010_v51 }
 0x164   : > { %v857_v2 = vmax.f32 %v825_v60, 0.0  ;;  %v873_v3 = vmax.f32 %v841_v61, 0.0 }
 0x165   : > { %v826_v0 = vadd.f32 %v2017_v59, %v787_v62  ;;  %v842_v1 = vadd.f32 %v2017_v59, %v803_v63 }
 0x167   : > { %v858_v4 = vmax.f32 %v826_v0, 0.0  ;;  %v874_v5 = vmax.f32 %v842_v1, 0.0 }
 0x169   : > { %v1344_v51 = vpack.c.bf16 %v858_v4, %v857_v2  ;;  %v1384_v6 = vpack.c.bf16 %v874_v5, %v873_v3 }
 0x16b   : > { %1392 = vst [vmem:[%s2028_s9 + $0x38] sm:$0xff] %v1344_v51   ;;  %1400 = vst [vmem:[%s2028_s9 + $0x78] sm:$0xff] %v1384_v6  }
 0x16c   : > { %1739 = shalt.err (!%p1736_p5)
}
 0x16d   : > { %s1740_s6 = scalar_lea.hbm %s2103_s29, 2048  ;;  %s1744_s27 = scalar_lea.hbm %s2159_s4, 4096 }
 0x16e   : > { %p1741_p7 = scmp.ne.s32.totalorder %s2103_s29, %s1740_s6  ;;  %p1745_p9 = scmp.lt.s32.totalorder %s2103_s29, %s2159_s4 }
 0x16f   : > { %p1746_p11 = scmp.lt.s32.totalorder %s1744_s27, %s1740_s6 }
 0x170   : > { %p1742_p6 = pnand %p1741_p7, %p1933_p13 }
 0x171   : > { %p1747_p12 = por %p1746_p11, %p1745_p9 }
 0x172   : > { %p1743_p4 = pneg %p1742_p6 }
 0x174   : > { %p1748_p1 = pnand %p1747_p12, %p1743_p4 }
 0x176   : > { %1751 = shalt.err (!%p1748_p1)
}
 0x177   : > { %s1819_s9 = smov 64   ;;  %s1820_s24 = smov 4  }
 0x178   : > { %1535 = dma.vmem_to_hbm [thread:$0]  (%p1933_p13), %s2105_s10, 2048, %s2103_s29, %s1036_s18, %s1819_s9, %s1819_s9, %s1820_s24  }
 0x179 PF: > { %s1065_s14 = sand.u32 1, %s1790_s15   ;;  %p2173_p8 = scmp.ne.s32.totalorder %s2165_s26, 0 }
 0x17a   : > { %p2174_p10 = scmp.ge.s32.totalorder %s1810_s20, 2  ;;  %s1066_s11 = scalar_lea.sflag [#allocation4], %s1065_s14 }
 0x17c   : > { %p1546_p0 = pnand %p2174_p10, %p2173_p8 }
 0x17e   : > { %p1547_p2 = pneg %p1546_p0 }
 0x180   : > { %1785 = dma.done.wait (%p1547_p2), %s1066_s11, 2048  }
 0x181   : > { %1787 = vsyncadd (%p1547_p2), %s1066_s11, 4294965248  ;;  %s21_s20 = sadd.s32 1, %s1810_s20   ;;  %s2175_s15 = smov %s1794_s16 }
 0x182   : > { %p18_p3 = scmp.ge.s32.totalorder %s21_s20, 4   ;;  %s2176_s16 = smov %s1798_s17 }
 0x183   : > { %s2177_s17 = smov %s1942_s28  ;;  %s2178_s18 = smov %s1806_s19 }
 0x184   : > { %s2179_s19 = smov %s2181_s5  ;;  %20 = sbr.rel (!%p18_p3) target bundleno = 9 (0x9), region = 92 }
 0x189   :  { %1071 = vsyncpa [#allocation3], 1 }
 0x18a   :  { %1073 = vsyncpa [#allocation3 + $0x1], 1 }
 0x18b   :  { %1074 = vsyncpa [#allocation6], 1 }
 0x18c   :  { %1075 = vsyncpa [#allocation4], 1 }
 0x18d   :  { %1077 = vsyncpa [#allocation4 + $0x1], 1 }

</bundles_post_ra>
